<compile_context>
chip_gen: v7x
topology: tpu7x:2x2x1
jax: 0.10.0
libtpu: 0.0.40
codegen_flags: <defaults>
</compile_context>

<pallas_src>
import math

import jax
import jax.numpy as jnp
from jax.experimental import pallas as pl
from jax.experimental.pallas import tpu as pltpu

_VMEM_LIMIT = 32 * 1024 * 1024  # safe scoped-VMEM budget on v5e/v6e/v7x


def _pick_tile(dim, target, align):
    """Largest `align`-multiple divisor of `dim` that is <= target (else full dim)."""
    if dim <= target:
        return dim
    t = (target // align) * align
    while t >= align:
        if dim % t == 0:
            return t
        t -= align
    return dim


# ---------------------------------------------------------------------------
# Kernel 1: tiled, pipelined linear layer   y = x @ W + b
# ---------------------------------------------------------------------------
def linear_kernel(x_ref, w_ref, b_ref, o_ref, acc_ref):
    @pl.when(pl.program_id(2) == 0)
    def _init():
        acc_ref[...] = jnp.zeros_like(acc_ref)

    acc_ref[...] += jnp.dot(x_ref[...], w_ref[...],
                            preferred_element_type=jnp.float32)

    @pl.when(pl.program_id(2) == pl.num_programs(2) - 1)
    def _finalize():
        # Bias add / epilogue stays in f32 (v5e has no bf16 VPU).
        o_ref[...] = (acc_ref[...] + b_ref[...]).astype(o_ref.dtype)


def linear(x, w, b, *, tm=256, tn=256, tk=512, compute_dtype=jnp.float32):
    """x: (M, K) @ w: (K, N) + b: (N,) -> (M, N) float32."""
    M, K = x.shape
    N = w.shape[1]
    tm = _pick_tile(M, tm, 8)
    tn = _pick_tile(N, tn, 128)
    tk = _pick_tile(K, tk, 128)

    x = x.astype(compute_dtype)
    w = w.astype(compute_dtype)
    b2 = b.reshape(1, N).astype(jnp.float32)

    grid = (M // tm, N // tn, K // tk)
    return pl.pallas_call(
        linear_kernel,
        out_shape=jax.ShapeDtypeStruct((M, N), jnp.float32),
        grid_spec=pltpu.PrefetchScalarGridSpec(
            num_scalar_prefetch=0,
            grid=grid,
            in_specs=[
                pl.BlockSpec((tm, tk), lambda i, j, k: (i, k)),
                pl.BlockSpec((tk, tn), lambda i, j, k: (k, j)),
                pl.BlockSpec((1, tn), lambda i, j, k: (0, j)),
            ],
            out_specs=pl.BlockSpec((tm, tn), lambda i, j, k: (i, j)),
            scratch_shapes=[pltpu.VMEM((tm, tn), jnp.float32)],
        ),
        compiler_params=pltpu.CompilerParams(
            dimension_semantics=("parallel", "parallel", "arbitrary"),
            vmem_limit_bytes=_VMEM_LIMIT,
        ),
    )(x, w, b2)


# ---------------------------------------------------------------------------
# Kernel 2: flash-style attention, all heads of one batch row-block per step.
# q/k/v arrive as (B, S, G, h, d_k); the G ("selector") axis lets the fused
# QKV projection output be consumed directly (G=3, selectors 0/1/2) without
# any jnp.split copies; cross-attention uses G=1 with selector 0.
# Online softmax over the kv axis.  1/sqrt(d_k) already folded into Q.
# ---------------------------------------------------------------------------
def flash_attn_kernel(q_ref, k_ref, v_ref, o_ref, m_sc, l_sc, acc_sc):
    kv = pl.program_id(2)

    @pl.when(kv == 0)
    def _init():
        m_sc[...] = jnp.full_like(m_sc, -jnp.inf)
        l_sc[...] = jnp.zeros_like(l_sc)
        acc_sc[...] = jnp.zeros_like(acc_sc)

    _, tq, _, h, d_k = q_ref.shape
    tkv = k_ref.shape[1]

    # Drop the size-1 dims (free) and go head-major for the MXU batch dim;
    # contractions are on the last dims (no materialized K^T).
    q = jnp.swapaxes(q_ref[...].reshape(tq, h, d_k), 0, 1)    # (h, tq, d_k)
    k = jnp.swapaxes(k_ref[...].reshape(tkv, h, d_k), 0, 1)   # (h, tkv, d_k)
    v = jnp.swapaxes(v_ref[...].reshape(tkv, h, d_k), 0, 1)   # (h, tkv, d_k)

    s = jnp.einsum("hqd,hkd->hqk", q, k,
                   preferred_element_type=jnp.float32)        # (h, tq, tkv)

    m_prev = m_sc[...]                                        # (h, tq, 1)
    m_new = jnp.maximum(m_prev, jnp.max(s, axis=-1, keepdims=True))
    alpha = jnp.exp(m_prev - m_new)
    p = jnp.exp(s - m_new)                                    # f32 softmax
    l_sc[...] = alpha * l_sc[...] + jnp.sum(p, axis=-1, keepdims=True)
    acc_sc[...] = alpha * acc_sc[...] + jnp.einsum(
        "hqk,hkd->hqd", p.astype(v.dtype), v,
        preferred_element_type=jnp.float32)
    m_sc[...] = m_new

    @pl.when(kv == pl.num_programs(2) - 1)
    def _finalize():
        out = acc_sc[...] * pl.reciprocal(l_sc[...], approx=True)  # (h, tq, d_k)
        o_ref[0] = jnp.swapaxes(out, 0, 1).astype(o_ref.dtype)     # (tq, h, d_k)


def sdpa(q, k, v, sel, *, tq=128, tkv=256, compute_dtype=jnp.float32):
    """q/k/v: (B, S*, G, h, d_k), sel=(iq, ik, iv) selects along the G axis.
    Scale already folded into q.  Returns (B, Sq, h, d_k)."""
    B, Sq, _, h, d_k = q.shape
    Skv = k.shape[1]
    tq = _pick_tile(Sq, tq, 8)
    tkv = _pick_tile(Skv, tkv, 128)
    iq, ik, iv = sel

    q = q.astype(compute_dtype)
    k = k.astype(compute_dtype)
    v = v.astype(compute_dtype)

    q_spec = pl.BlockSpec((1, tq, 1, h, d_k),
                          lambda b, qi, ki, s=iq: (b, qi, s, 0, 0))
    k_spec = pl.BlockSpec((1, tkv, 1, h, d_k),
                          lambda b, qi, ki, s=ik: (b, ki, s, 0, 0))
    v_spec = pl.BlockSpec((1, tkv, 1, h, d_k),
                          lambda b, qi, ki, s=iv: (b, ki, s, 0, 0))
    o_spec = pl.BlockSpec((1, tq, h, d_k), lambda b, qi, ki: (b, qi, 0, 0))

    return pl.pallas_call(
        flash_attn_kernel,
        out_shape=jax.ShapeDtypeStruct((B, Sq, h, d_k), jnp.float32),
        grid_spec=pltpu.PrefetchScalarGridSpec(
            num_scalar_prefetch=0,
            grid=(B, Sq // tq, Skv // tkv),
            in_specs=[q_spec, k_spec, v_spec],
            out_specs=o_spec,
            scratch_shapes=[
                pltpu.VMEM((h, tq, 1), jnp.float32),    # running max
                pltpu.VMEM((h, tq, 1), jnp.float32),    # running denom
                pltpu.VMEM((h, tq, d_k), jnp.float32),  # running numerator
            ],
        ),
        compiler_params=pltpu.CompilerParams(
            dimension_semantics=("parallel", "parallel", "arbitrary"),
            vmem_limit_bytes=_VMEM_LIMIT,
        ),
    )(q, k, v)


# ---------------------------------------------------------------------------
# MultiHeadAttention forward (plain-JAX glue; only free reshapes between kernels)
# ---------------------------------------------------------------------------
def multi_head_attention(params, query, key, value, h, d_k,
                         *, compute_dtype=jnp.float32):
    B, Sq, d_model = query.shape
    Skv = key.shape[1]
    scale = 1.0 / math.sqrt(d_k)
    # Fold the 1/sqrt(d_k) scale into the Q projection (free).
    wq = params["w0"] * scale
    bq = params["b0"] * scale

    if (query is key) and (key is value):
        # Self-attention: fused QKV projection (one HBM pass over activations),
        # consumed directly by the attention kernel via selector index_maps.
        w_qkv = jnp.concatenate([wq, params["w1"], params["w2"]], axis=1)
        b_qkv = jnp.concatenate([bq, params["b1"], params["b2"]], axis=0)
        qkv = linear(query.reshape(B * Sq, d_model), w_qkv, b_qkv,
                     compute_dtype=compute_dtype)              # (B*Sq, 3*d_model)
        qkv = qkv.reshape(B, Sq, 3, h, d_k)                    # free reshape
        q = k = v = qkv
        sel = (0, 1, 2)
    else:
        # Cross-attention: separate projections (fusion is invalid here).
        q = linear(query.reshape(B * Sq, d_model), wq, bq,
                   compute_dtype=compute_dtype).reshape(B, Sq, 1, h, d_k)
        k = linear(key.reshape(B * Skv, d_model), params["w1"], params["b1"],
                   compute_dtype=compute_dtype).reshape(B, Skv, 1, h, d_k)
        v = linear(value.reshape(B * Skv, d_model), params["w2"], params["b2"],
                   compute_dtype=compute_dtype).reshape(B, Skv, 1, h, d_k)
        sel = (0, 0, 0)

    x = sdpa(q, k, v, sel, compute_dtype=compute_dtype)        # (B, Sq, h, d_k)
    x = x.reshape(B * Sq, h * d_k)                             # free reshape

    out = linear(x, params["w3"], params["b3"], compute_dtype=compute_dtype)
    return out.reshape(B, Sq, d_model)


def init_params(key, d_model):
    # 4 Linear(d_model, d_model) layers, deterministic init.
    params = {}
    bound = 1.0 / math.sqrt(d_model)
    for i in range(4):
        key, kw, kb = jax.random.split(key, 3)
        # Stored as (in, out) so y = x @ W + b  (== PyTorch x @ W_pt.T + b).
        params[f"w{i}"] = jax.random.uniform(
            kw, (d_model, d_model), jnp.float32, -bound, bound)
        params[f"b{i}"] = jax.random.uniform(
            kb, (d_model,), jnp.float32, -bound, bound)
    return params


if __name__ == "__main__":
    B, Sq, Skv, h, d_model = 2, 8, 16, 4, 32
    d_k = d_model // h

    root = jax.random.PRNGKey(0)
    kq, kk, kv, kp = jax.random.split(root, 4)
    query = jax.random.normal(kq, (B, Sq, d_model), jnp.float32)
    key_ = jax.random.normal(kk, (B, Skv, d_model), jnp.float32)
    value = jax.random.normal(kv, (B, Skv, d_model), jnp.float32)
    params = init_params(kp, d_model)

    # Cross-attention path (separate Q/K/V projections, Skv != Sq).
    out = multi_head_attention(params, query, key_, value, h, d_k)
    jax.block_until_ready(out)
    # Self-attention path (fused QKV projection, selector-indexed attention).
    out_self = multi_head_attention(params, query, query, query, h, d_k)
    jax.block_until_ready(out_self)

    # Pure-JAX reference check.
    def ref_forward(params, q_in, k_in, v_in):
        def lin(x, i):
            return x @ params[f"w{i}"] + params[f"b{i}"]
        Bq, Lq, _ = q_in.shape
        Lk = k_in.shape[1]
        q = lin(q_in, 0).reshape(Bq, Lq, h, d_k).transpose(0, 2, 1, 3)
        k = lin(k_in, 1).reshape(Bq, Lk, h, d_k).transpose(0, 2, 1, 3)
        v = lin(v_in, 2).reshape(Bq, Lk, h, d_k).transpose(0, 2, 1, 3)
        scores = jnp.einsum("bhqd,bhkd->bhqk", q, k) / math.sqrt(d_k)
        p = jax.nn.softmax(scores, axis=-1)
        x = jnp.einsum("bhqk,bhkd->bhqd", p, v)
        x = x.transpose(0, 2, 1, 3).reshape(Bq, Lq, h * d_k)
        return lin(x, 3)

    ref = ref_forward(params, query, key_, value)
    ref_self = ref_forward(params, query, query, query)
    # Slightly loosened tolerance: pl.reciprocal(approx=True) in the softmax.
    assert jnp.allclose(out, ref, atol=2e-3, rtol=2e-3), "cross-attn mismatch"
    assert jnp.allclose(out_self, ref_self, atol=2e-3, rtol=2e-3), "self-attn mismatch"
    print("KERNEL_OK")
</pallas_src>

<mosaic_0001>
module attributes {stable_mosaic.version = 11 : i64} {
  func.func @linear_kernel(%arg0: i32, %arg1: i32, %arg2: i32, %arg3: memref<16x32xf32, #tpu.memory_space<vmem>>, %arg4: memref<32x32xf32, #tpu.memory_space<vmem>>, %arg5: memref<1x32xf32, #tpu.memory_space<vmem>>, %arg6: memref<16x32xf32, #tpu.memory_space<vmem>>, %arg7: memref<16x32xf32, #tpu.memory_space<vmem>>) attributes {dimension_semantics = [#tpu.dimension_semantics<parallel>, #tpu.dimension_semantics<parallel>, #tpu.dimension_semantics<arbitrary>], iteration_bounds = array<i64: 1, 1, 1>, scalar_prefetch = 0 : i64, scratch_operands = 1 : i64, tpu.core_type = #tpu.core_type<tc>, window_params = [{transform_indices = @transform_0, window_bounds = array<i64: 16, 32>}, {transform_indices = @transform_1, window_bounds = array<i64: 32, 32>}, {transform_indices = @transform_2, window_bounds = array<i64: 1, 32>}, {transform_indices = @transform_3, window_bounds = array<i64: 16, 32>}]} {
    %c0_i32 = arith.constant 0 : i32
    %0 = arith.cmpi eq, %arg2, %c0_i32 : i32
    %1 = arith.extui %0 : i1 to i32
    %c0_i32_0 = arith.constant 0 : i32
    %2 = arith.cmpi ne, %1, %c0_i32_0 : i32
    scf.if %2 {
      %cst_10 = arith.constant 0.000000e+00 : f32
      %12 = vector.broadcast %cst_10 : f32 to vector<16x32xf32>
      %c0_11 = arith.constant 0 : index
      %c0_12 = arith.constant 0 : index
      %13 = vector.load %arg7[%c0_11, %c0_12] : memref<16x32xf32, #tpu.memory_space<vmem>>, vector<16x32xf32>
      tpu.vector_store %arg7[%c0_11, %c0_12], %12 {strides = array<i32>} : memref<16x32xf32, #tpu.memory_space<vmem>>, vector<16x32xf32>,
    } else {
    }
    %c0 = arith.constant 0 : index
    %c0_1 = arith.constant 0 : index
    %3 = vector.load %arg7[%c0, %c0_1] : memref<16x32xf32, #tpu.memory_space<vmem>>, vector<16x32xf32>
    %c0_2 = arith.constant 0 : index
    %c0_3 = arith.constant 0 : index
    %4 = vector.load %arg3[%c0_2, %c0_3] : memref<16x32xf32, #tpu.memory_space<vmem>>, vector<16x32xf32>
    %c0_4 = arith.constant 0 : index
    %c0_5 = arith.constant 0 : index
    %5 = vector.load %arg4[%c0_4, %c0_5] : memref<32x32xf32, #tpu.memory_space<vmem>>, vector<32x32xf32>
    %cst = arith.constant dense<0.000000e+00> : vector<16x32xf32>
    %6 = tpu.matmul %4, %5, %cst {dimension_numbers = #tpu.dot_dimension_numbers<[1], [0], [0], [1], [0, 0, 1, 1], [], []>} : vector<16x32xf32>, vector<32x32xf32>, vector<16x32xf32> -> vector<16x32xf32>
    %7 = arith.addf %3, %6 : vector<16x32xf32>
    %c0_6 = arith.constant 0 : index
    %c0_7 = arith.constant 0 : index
    %8 = vector.load %arg7[%c0_6, %c0_7] : memref<16x32xf32, #tpu.memory_space<vmem>>, vector<16x32xf32>
    tpu.vector_store %arg7[%c0_6, %c0_7], %7 {strides = array<i32>} : memref<16x32xf32, #tpu.memory_space<vmem>>, vector<16x32xf32>,
    %c0_i32_8 = arith.constant 0 : i32
    %9 = arith.cmpi eq, %arg2, %c0_i32_8 : i32
    %10 = arith.extui %9 : i1 to i32
    %c0_i32_9 = arith.constant 0 : i32
    %11 = arith.cmpi ne, %10, %c0_i32_9 : i32
    scf.if %11 {
      %c0_10 = arith.constant 0 : index
      %c0_11 = arith.constant 0 : index
      %12 = vector.load %arg7[%c0_10, %c0_11] : memref<16x32xf32, #tpu.memory_space<vmem>>, vector<16x32xf32>
      %c0_12 = arith.constant 0 : index
      %c0_13 = arith.constant 0 : index
      %13 = vector.load %arg5[%c0_12, %c0_13] : memref<1x32xf32, #tpu.memory_space<vmem>>, vector<1x32xf32>
      %14 = vector.broadcast %13 : vector<1x32xf32> to vector<16x32xf32>
      %15 = arith.addf %12, %14 : vector<16x32xf32>
      %c0_14 = arith.constant 0 : index
      %c0_15 = arith.constant 0 : index
      %16 = vector.load %arg6[%c0_14, %c0_15] : memref<16x32xf32, #tpu.memory_space<vmem>>, vector<16x32xf32>
      tpu.vector_store %arg6[%c0_14, %c0_15], %15 {strides = array<i32>} : memref<16x32xf32, #tpu.memory_space<vmem>>, vector<16x32xf32>,
    } else {
    }
    return
  }
  func.func @transform_0(%arg0: i32, %arg1: i32, %arg2: i32) -> (i32, i32) {
    %c0_i32 = arith.constant 0 : i32
    return %arg0, %arg2 : i32, i32
  }
  func.func @transform_1(%arg0: i32, %arg1: i32, %arg2: i32) -> (i32, i32) {
    %c0_i32 = arith.constant 0 : i32
    return %arg2, %arg1 : i32, i32
  }
  func.func @transform_2(%arg0: i32, %arg1: i32, %arg2: i32) -> (i32, i32) {
    %c0_i32 = arith.constant 0 : i32
    %c0_i32_0 = arith.constant 0 : i32
    return %c0_i32, %arg1 : i32, i32
  }
  func.func @transform_3(%arg0: i32, %arg1: i32, %arg2: i32) -> (i32, i32) {
    %c0_i32 = arith.constant 0 : i32
    return %arg0, %arg1 : i32, i32
  }
}

</mosaic_0001>

<bundles_post_ra>
// kernel: tpu_custom_call.1
= control target key start
LH: loop header
LB: loop body
LE: loop exit
PB: predicated region body
PF: predicated region fallthrough
CT: control target
= control target key end

     0   :  { %8 = vsyncpa [#allocation4], 0  ;;  %s366_s0 = inlined_call_operand.hbm [shape: f32[16,32], index: 0, kind: input, shape index: {}]   ;;  %s367_s1 = inlined_call_operand.hbm [shape: f32[32,32], index: 1, kind: input, shape index: {}]   ;;  %s368_s2 = inlined_call_operand.vmem [shape: f32[1,32], index: 2, kind: input, shape index: {}]   ;;  %s369_s3 = inlined_call_operand.hbm [shape: f32[16,32], index: 3, kind: output, shape index: {}]  }
   0x1   :  { %9 = vsyncpa [#allocation7], 0 }
   0x2   :  { %10 = vsyncpa [#allocation5], 0  ;;  %s284_s12 = smov [#allocation3]   ;;  %s212_s16 = scalar_lea.hbm %s366_s0, 256 }
   0x3   :  { %s16_s13 = sshll.u32 %s284_s12, 4  ;;  %p213_p0 = scmp.ne.s32.totalorder %s366_s0, %s212_s16  ;;  %s17_s13 = int_to_ptr.vmem [resolvable:$true] %s16_s13 }
   0x4   :  { %p216_p1 = scmp.lt.u32.totalorder %s212_s16, %s366_s0 }
   0x6   :  { %p218_p2 = pnand %p216_p1, %p213_p0 }
   0x8   :  { %221 = shalt.err (!%p218_p2)
}
   0x9   :  { %s222_s21 = scalar_lea.vmem %s17_s13, 256  ;;  %p227_p4 = scmp.lt.s32.totalorder %s17_s13, %s17_s13 }
   0xa   :  { %p223_p3 = scmp.ne.s32.totalorder %s17_s13, %s222_s21  ;;  %p228_p5 = scmp.lt.s32.totalorder %s222_s21, %s222_s21 }
   0xc   :  { %p229_p6 = por %p228_p5, %p227_p4 }
   0xe   :  { %p230_p7 = pnand %p229_p6, %p223_p3 }
  0x10   :  { %233 = shalt.err (!%p230_p7)
}
  0x11   :  { %s285_s22 = smov 128   ;;  %s286_s23 = smov 8  }
  0x12   :  { %22 = dma.hbm_to_vmem [thread:$0]  %s366_s0, 256, %s17_s13, [#allocation4], %s285_s22, %s285_s22, %s286_s23  }
  0x13   :  { %s287_s26 = smov [#allocation6]   ;;  %s234_s30 = scalar_lea.hbm %s367_s1, 512 }
  0x14   :  { %s28_s27 = sshll.u32 %s287_s26, 4  ;;  %p235_p8 = scmp.ne.s32.totalorder %s367_s1, %s234_s30  ;;  %s29_s27 = int_to_ptr.vmem [resolvable:$true] %s28_s27 }
  0x15   :  { %p238_p9 = scmp.lt.u32.totalorder %s234_s30, %s367_s1 }
  0x17   :  { %p240_p10 = pnand %p238_p9, %p235_p8 }
  0x19   :  { %243 = shalt.err (!%p240_p10)
}
  0x1a   :  { %s244_s8 = scalar_lea.vmem %s29_s27, 512  ;;  %p249_p12 = scmp.lt.s32.totalorder %s29_s27, %s29_s27 }
  0x1b   :  { %p245_p11 = scmp.ne.s32.totalorder %s29_s27, %s244_s8  ;;  %p250_p13 = scmp.lt.s32.totalorder %s244_s8, %s244_s8 }
  0x1d   :  { %p251_p0 = por %p250_p13, %p249_p12 }
  0x1f   :  { %p252_p1 = pnand %p251_p0, %p245_p11 }
  0x21   :  { %255 = shalt.err (!%p252_p1)
}
  0x22   :  { %34 = dma.hbm_to_vmem [thread:$0]  %s367_s1, 512, %s29_s27, [#allocation7], %s285_s22, %s285_s22, %s286_s23  }
  0x23   :  { %278 = dma.done.wait [#allocation4], 256  }
  0x24   :  { %279 = vsyncadd [#allocation4], 4294967040 }
  0x25   :  { %280 = dma.done.wait [#allocation7], 512  }
  0x26   :  { %281 = vsyncadd [#allocation7], 4294966784  ;;  %vm47_vm0 = vcmask 261120   ;;  %v288_v0 = vmov 0.0   ;;  %v54_v1 = vld [vmem:[#allocation6] sm:$0xff]  ;;  %v55_v2 = vld [vmem:[#allocation6 + $0x8] sm:$0xff] }
  0x27   :  { %49 = vst.msk [vmem:[#allocation2 + $0x8] sm:$0xff] %vm47_vm0, %v288_v0  ;;  %48 = vst.msk [vmem:[#allocation2] sm:$0xff] %vm47_vm0, %v288_v0  ;;  %v56_v3 = vld [vmem:[#allocation6 + $0x10] sm:$0xff]  ;;  %v198_v4 = vpack.c.bf16 %v55_v2, %v54_v1  ;;  %v57_v5 = vld [vmem:[#allocation6 + $0x18] sm:$0xff]  ;;  %s289_s11 = smov [#allocation8]  }
  0x28   :  { %v52_v6 = vld [vmem:[#allocation3] sm:$0xff]  ;;  %v202_v7 = vpack.c.bf16 %v57_v5, %v56_v3  ;;  %v53_v8 = vld [vmem:[#allocation3 + $0x8] sm:$0xff]  ;;  %v180_v15 = vld [vmem:[%s368_s2] ss:$0 sm:$0xff]  ;;  %s165_s12 = sshll.u32 %s289_s11, 4  ;;  %s166_s12 = int_to_ptr.vmem [resolvable:$true] %s165_s12 }
  0x29   :  { %195 = vmatprep.mubr.msk.f32.mxu0 %vm47_vm0, %v52_v6  ;;  %199 = vmatprep.subr.bf16.mxu0 %v198_v4  ;;  %s256_s13 = scalar_lea.vmem %s166_s12, 256  ;;  %p261_p3 = scmp.lt.s32.totalorder %s166_s12, %s166_s12 }
  0x2a   :  { %201 = vmatpush3.bf16.msra.mxu0 %v198_v4  ;;  %p257_p2 = scmp.ne.s32.totalorder %s166_s12, %s256_s13  ;;  %p262_p4 = scmp.lt.s32.totalorder %s256_s13, %s256_s13 }
  0x2b   :  { %203 = vmatprep.subr.bf16.mxu0 %v202_v7 }
  0x2c   :  { %p263_p5 = por %p262_p4, %p261_p3 }
  0x2e   :  { %205 = vmatpush3.bf16.msra.mxu0 %v202_v7  ;;  %v51_v9 = vld [vmem:[#allocation2 + $0x8] sm:$0xff]  ;;  %v50_v10 = vld [vmem:[#allocation2] sm:$0xff]  ;;  %p264_p6 = pnand %p263_p5, %p257_p2 }
  0x31   :  { %196 = vmatmul.mubr.msk.f32.vlgmr.msra.gmra.mrb[0].mxu0 %vm47_vm0, %v53_v8 }
 0x104   :  { %v197_v11 = vpop.f32.mrb[0].mxu0 }
 0x105   :  { %v141_v12 = vadd.f32 %v197_v11, %v51_v9  ;;  %v131_v13 = vpop.f32.mrb[1].mxu0 }
 0x106   :  { %v140_v14 = vadd.f32 %v131_v13, %v50_v10 }
 0x107   :  { %143 = vst.msk [vmem:[#allocation2 + $0x8] sm:$0xff] %vm47_vm0, %v141_v12 }
 0x108   :  { %142 = vst.msk [vmem:[#allocation2] sm:$0xff] %vm47_vm0, %v140_v14 }
 0x10e   :  { %v148_v16 = vld [vmem:[#allocation2 + $0x8] sm:$0xff] }
 0x10f   :  { %v147_v17 = vld [vmem:[#allocation2] sm:$0xff]  ;;  %v157_v18 = vadd.f32 %v180_v15, %v148_v16 }
 0x110   :  { %v156_v19 = vadd.f32 %v180_v15, %v147_v17 }
 0x111   :  { %159 = vst.msk [vmem:[#allocation8 + $0x8] sm:$0xff] %vm47_vm0, %v157_v18 }
 0x112   :  { %158 = vst.msk [vmem:[#allocation8] sm:$0xff] %vm47_vm0, %v156_v19 }
 0x113   :  { %267 = shalt.err (!%p264_p6)
}
 0x114   :  { %s268_s15 = scalar_lea.hbm %s369_s3, 256 }
 0x115   :  { %p269_p7 = scmp.ne.s32.totalorder %s369_s3, %s268_s15  ;;  %p272_p8 = scmp.lt.u32.totalorder %s268_s15, %s369_s3 }
 0x117   :  { %p274_p9 = pnand %p272_p8, %p269_p7 }
 0x119   :  { %277 = shalt.err (!%p274_p9)
}
 0x11a   :  { %171 = dma.vmem_to_hbm [thread:$0]  %s166_s12, 256, %s369_s3, [#allocation5], %s285_s22, %s285_s22, %s286_s23  }
 0x11b   :  { %282 = dma.done.wait [#allocation5], 256  }
 0x11c   :  { %283 = vsyncadd [#allocation5], 4294967040 }
 0x11d   :  { %175 = vsyncpa [#allocation4], 1 }
 0x11e   :  { %176 = vsyncpa [#allocation7], 1 }
 0x11f   :  { %177 = vsyncpa [#allocation5], 1 }

</bundles_post_ra>
